<compile_context>
chip_gen: v7x
topology: tpu7x:2x2x1
jax: 0.10.0
libtpu: 0.0.40
codegen_flags: <defaults>
</compile_context>

<pallas_src>
import functools

import jax
import jax.numpy as jnp
from jax.experimental import pallas as pl
from jax.experimental.pallas import tpu as pltpu


def _ce_kernel(logits_ref, target_ref, sum_ref, cnt_ref, *,
               ignore_index, hw, tile_p, tiles_per_split, needs_mask,
               guard_gather):
    """One pixel tile of one (batch, split) slab.

    logits_ref: (C, TILE_P) logits       (batch dim squeezed)
    target_ref: (1, TILE_P) int32 labels (batch dim squeezed)
    sum_ref   : (1, TILE_P) f32 per-lane loss accumulator (resident over tiles)
    cnt_ref   : (1, TILE_P) f32 per-lane valid-pixel count accumulator
    """
    s = pl.program_id(1)
    j = pl.program_id(2)

    @pl.when(j == 0)
    def _():
        sum_ref[...] = jnp.zeros_like(sum_ref)
        cnt_ref[...] = jnp.zeros_like(cnt_ref)

    x = logits_ref[...].astype(jnp.float32)          # (C, TILE_P)
    t = target_ref[...]                              # (1, TILE_P) int32

    valid = t != ignore_index                        # (1, TILE_P)
    if needs_mask:
        # Ragged tail only: mask lanes past the real pixel count.  The tile
        # picker prefers tiles that divide HW, so this path is usually dead.
        lane = jax.lax.broadcasted_iota(jnp.int32, (1, tile_p), 1)
        tile_start = (s * tiles_per_split + j) * tile_p
        valid = jnp.logical_and(valid, (tile_start + lane) < hw)

    # Numerically stable log-softmax denominator, reduced over the class
    # (sublane) axis -> (1, TILE_P).  Pure VPU/XLU/EUP; no MXU.
    m = jnp.max(x, axis=0, keepdims=True)
    lse = jnp.log(jnp.sum(jnp.exp(x - m), axis=0, keepdims=True)) + m

    # Gather the target-class logit via a one-hot compare over sublanes.
    # Ignored pixels are masked by `valid` before accumulation, so no safe
    # index substitution is needed unless ignore_index is itself a class id.
    cls_idx = jax.lax.broadcasted_iota(jnp.int32, x.shape, 0)    # (C, TILE_P)
    if guard_gather:
        t_cmp = jnp.where(valid, t, jnp.int32(-1))
    else:
        t_cmp = t
    tgt_logit = jnp.sum(jnp.where(cls_idx == t_cmp, x, 0.0),
                        axis=0, keepdims=True)

    # Lane-wise partial accumulation (mask BEFORE accumulate — never flip).
    sum_ref[...] += jnp.where(valid, lse - tgt_logit, 0.0)
    cnt_ref[...] += valid.astype(jnp.float32)


def _pick_tile(hw, num_classes, logit_bytes, vmem_budget_bytes, max_tile):
    """Choose a lane tile: VMEM-budgeted, multiple of 128, prefer dividing HW."""
    cdiv = lambda a, b: -(-a // b)
    # Bytes per pixel held in VMEM: double-buffered logits + int32 target,
    # plus the two f32 resident output lanes (also x2 buffers).
    per_pixel = 2 * (num_classes * logit_bytes + 4) + 2 * 2 * 4
    cap = max(128, (vmem_budget_bytes // per_pixel) // 128 * 128)
    cap = min(cap, int(max_tile) // 128 * 128)
    cap = min(cap, cdiv(hw, 128) * 128)
    cap = max(cap, 128)

    # Prefer the largest tile <= cap that exactly divides HW (no tail mask,
    # no undefined padded lanes), as long as it is not pathologically small.
    if hw % 128 == 0:
        for d in range(cap // 128, 0, -1):
            t = d * 128
            if hw % t == 0:
                if 2 * t >= cap:
                    return t, hw // t, False
                break
    num_tiles = cdiv(hw, cap)
    return cap, num_tiles, (num_tiles * cap) != hw


def cross_entropy_loss(preds, target, *, ignore_index=255,
                       vmem_budget_bytes=12 * 1024 * 1024,
                       max_tile_pixels=65536):
    """CELoss(pred, target): softmax cross-entropy, mean over non-ignored pixels.

    preds : (N, C, H, W) float logits (NCHW, consumed without transpose; bf16 OK)
    target: (N, H, W)    int class indices (ignore_index skipped)
    Returns NaN if every pixel is ignored (matches PyTorch 'mean').
    """
    N, C, H, W = preds.shape
    HW = H * W

    # Free reshapes only — no NHWC transpose, no dtype cast, no jnp.pad passes.
    logits = preds.reshape(N, C, HW)
    tgt = target.reshape(N, 1, HW).astype(jnp.int32)

    logit_bytes = jnp.dtype(preds.dtype).itemsize
    tile_p, num_tiles, needs_mask = _pick_tile(
        HW, C, logit_bytes, vmem_budget_bytes, max_tile_pixels)

    # Present >=2 parallel work units when N == 1 so v7x's 2 TensorCores both
    # run (cosmetic on 1-TC v5e/v6e).  Only split when it divides cleanly so
    # no fully out-of-bounds blocks are ever addressed.
    if N == 1 and num_tiles >= 2 and num_tiles % 2 == 0:
        n_splits = 2
    else:
        n_splits = 1
    tiles_per_split = num_tiles // n_splits

    kernel = functools.partial(
        _ce_kernel,
        ignore_index=int(ignore_index), hw=HW, tile_p=tile_p,
        tiles_per_split=tiles_per_split, needs_mask=needs_mask,
        guard_gather=(0 <= int(ignore_index) < C))

    sum_out, cnt_out = pl.pallas_call(
        kernel,
        out_shape=(
            jax.ShapeDtypeStruct((N, n_splits, 1, tile_p), jnp.float32),
            jax.ShapeDtypeStruct((N, n_splits, 1, tile_p), jnp.float32),
        ),
        grid_spec=pltpu.PrefetchScalarGridSpec(
            num_scalar_prefetch=0,
            grid=(N, n_splits, tiles_per_split),
            in_specs=[
                pl.BlockSpec((pl.Squeezed(), C, tile_p),
                             lambda n, s, j: (n, 0, s * tiles_per_split + j)),
                pl.BlockSpec((pl.Squeezed(), 1, tile_p),
                             lambda n, s, j: (n, 0, s * tiles_per_split + j)),
            ],
            out_specs=[
                pl.BlockSpec((pl.Squeezed(), pl.Squeezed(), 1, tile_p),
                             lambda n, s, j: (n, s, 0, 0)),
                pl.BlockSpec((pl.Squeezed(), pl.Squeezed(), 1, tile_p),
                             lambda n, s, j: (n, s, 0, 0)),
            ],
        ),
        compiler_params=pltpu.CompilerParams(
            # (batch, core-split) shardable across TensorCores; pixel-tile
            # axis is the resident-accumulator reduction.
            dimension_semantics=("parallel", "parallel", "arbitrary"),
        ),
    )(logits, tgt)

    # 'mean' reduction: divide by number of non-ignored pixels.
    return jnp.sum(sum_out) / jnp.sum(cnt_out)


class MyLossPallas:
    """JAX/Pallas port of rsseg myLoss (default config: single CELoss)."""

    def __init__(self, loss_name=("CELoss",), loss_weight=(1.0,),
                 ignore_index=255, reduction="mean"):
        assert reduction == "mean"
        self.loss_name = list(loss_name)
        self.loss_weight = list(loss_weight)
        self.ignore_index = ignore_index
        self.loss = []
        for name in self.loss_name:
            if name == "CELoss":
                self.loss.append(
                    functools.partial(cross_entropy_loss,
                                      ignore_index=self.ignore_index))
            else:
                # TODO(synk): only CELoss is implemented; other rsseg losses
                # (e.g. DiceLoss/LovaszLoss) would need their own kernels.
                raise NotImplementedError(name)

    def __call__(self, preds, target):
        all_loss = {"total_loss": jnp.float32(0.0)}
        for i in range(len(self.loss)):
            loss = self.loss[i](preds[i], target) * self.loss_weight[i]
            if self.loss_name[i] in all_loss:
                all_loss[self.loss_name[i]] = all_loss[self.loss_name[i]] + loss
            else:
                all_loss[self.loss_name[i]] = loss
            all_loss["total_loss"] = all_loss["total_loss"] + loss
        return all_loss


def _ref_ce(preds, target, ignore_index=255):
    """Plain-JAX reference (NHWC log-softmax gather, mean over valid pixels)."""
    N, C, H, W = preds.shape
    logits = jnp.transpose(preds, (0, 2, 3, 1)).reshape(-1, C).astype(jnp.float32)
    t = target.reshape(-1)
    valid = t != ignore_index
    logp = jax.nn.log_softmax(logits, axis=-1)
    picked = jnp.take_along_axis(
        logp, jnp.where(valid, t, 0)[:, None], axis=-1)[:, 0]
    return -jnp.sum(jnp.where(valid, picked, 0.0)) / jnp.sum(valid)


if __name__ == "__main__":
    key = jax.random.PRNGKey(0)

    # ---- Test 1: small default shape (N=2, C=4, 16x16), f32 ----------------
    k1, k2, k3, key = jax.random.split(key, 4)
    N, C, H, W = 2, 4, 16, 16
    preds0 = jax.random.normal(k1, (N, C, H, W), dtype=jnp.float32)
    target0 = jax.random.randint(k2, (N, H, W), 0, C, dtype=jnp.int32)
    target0 = jnp.where(jax.random.bernoulli(k3, 0.1, (N, H, W)), 255, target0)

    loss_fn = MyLossPallas(loss_name=["CELoss"], loss_weight=[1.0],
                           ignore_index=255, reduction="mean")
    out = loss_fn([preds0], target0)
    jax.block_until_ready(out["total_loss"])
    ref = _ref_ce(preds0, target0)
    assert jnp.allclose(out["total_loss"], ref, rtol=1e-4, atol=1e-5), (
        out["total_loss"], ref)

    # ---- Test 2: C=19, HW not a multiple of 128 (ragged-tail mask path) ----
    k1, k2, k3, key = jax.random.split(key, 4)
    preds1 = jax.random.normal(k1, (1, 19, 10, 13), dtype=jnp.float32)
    target1 = jax.random.randint(k2, (1, 10, 13), 0, 19, dtype=jnp.int32)
    target1 = jnp.where(jax.random.bernoulli(k3, 0.15, (1, 10, 13)), 255, target1)
    got1 = cross_entropy_loss(preds1, target1)
    jax.block_until_ready(got1)
    ref1 = _ref_ce(preds1, target1)
    assert jnp.allclose(got1, ref1, rtol=1e-4, atol=1e-5), (got1, ref1)

    # ---- Test 3: bf16 logits, C=19, multi-tile + N==1 core-split path ------
    k1, k2, k3, key = jax.random.split(key, 4)
    preds2 = jax.random.normal(k1, (1, 19, 16, 64), dtype=jnp.bfloat16)
    target2 = jax.random.randint(k2, (1, 16, 64), 0, 19, dtype=jnp.int32)
    target2 = jnp.where(jax.random.bernoulli(k3, 0.1, (1, 16, 64)), 255, target2)
    # Shrink the tile cap so this small input exercises tiles_per_split > 1
    # and the 2-way split (grid = (1, 2, 2)).
    got2 = cross_entropy_loss(preds2, target2, max_tile_pixels=256)
    jax.block_until_ready(got2)
    ref2 = _ref_ce(preds2, target2)
    assert jnp.allclose(got2, ref2, rtol=1e-4, atol=1e-4), (got2, ref2)

    print("KERNEL_OK")
</pallas_src>

<mosaic_0001>
module attributes {stable_mosaic.version = 11 : i64} {
  func.func @_ce_kernel(%arg0: i32, %arg1: i32, %arg2: i32, %arg3: memref<1x4x256xf32, #tpu.memory_space<vmem>>, %arg4: memref<1x1x256xi32, #tpu.memory_space<vmem>>, %arg5: memref<1x1x1x256xf32, #tpu.memory_space<vmem>>, %arg6: memref<1x1x1x256xf32, #tpu.memory_space<vmem>>) attributes {dimension_semantics = [#tpu.dimension_semantics<parallel>, #tpu.dimension_semantics<parallel>, #tpu.dimension_semantics<arbitrary>], iteration_bounds = array<i64: 2, 1, 1>, scalar_prefetch = 0 : i64, scratch_operands = 0 : i64, tpu.core_type = #tpu.core_type<tc>, window_params = [{transform_indices = @transform_0, window_bounds = array<i64: 1, 4, 256>}, {transform_indices = @transform_1, window_bounds = array<i64: 1, 1, 256>}, {transform_indices = @transform_2, window_bounds = array<i64: 1, 1, 1, 256>}, {transform_indices = @transform_3, window_bounds = array<i64: 1, 1, 1, 256>}]} {
    %c0_i32 = arith.constant 0 : i32
    %0 = arith.cmpi eq, %arg2, %c0_i32 : i32
    %1 = arith.extui %0 : i1 to i32
    %c0_i32_0 = arith.constant 0 : i32
    %2 = arith.cmpi ne, %1, %c0_i32_0 : i32
    scf.if %2 {
      %cst_26 = arith.constant 0.000000e+00 : f32
      %42 = vector.broadcast %cst_26 : f32 to vector<1x256xf32>
      %c0_27 = arith.constant 0 : index
      %c0_28 = arith.constant 0 : index
      %c0_29 = arith.constant 0 : index
      %c0_30 = arith.constant 0 : index
      %43 = vector.load %arg5[%c0_27, %c0_28, %c0_29, %c0_30] : memref<1x1x1x256xf32, #tpu.memory_space<vmem>>, vector<1x1x1x256xf32>
      %44 = vector.shape_cast %43 : vector<1x1x1x256xf32> to vector<1x256xf32>
      %45 = vector.shape_cast %42 : vector<1x256xf32> to vector<1x1x1x256xf32>
      tpu.vector_store %arg5[%c0_27, %c0_28, %c0_29, %c0_30], %45 {strides = array<i32>} : memref<1x1x1x256xf32, #tpu.memory_space<vmem>>, vector<1x1x1x256xf32>,
      %cst_31 = arith.constant 0.000000e+00 : f32
      %46 = vector.broadcast %cst_31 : f32 to vector<1x256xf32>
      %c0_32 = arith.constant 0 : index
      %c0_33 = arith.constant 0 : index
      %c0_34 = arith.constant 0 : index
      %c0_35 = arith.constant 0 : index
      %47 = vector.load %arg6[%c0_32, %c0_33, %c0_34, %c0_35] : memref<1x1x1x256xf32, #tpu.memory_space<vmem>>, vector<1x1x1x256xf32>
      %48 = vector.shape_cast %47 : vector<1x1x1x256xf32> to vector<1x256xf32>
      %49 = vector.shape_cast %46 : vector<1x256xf32> to vector<1x1x1x256xf32>
      tpu.vector_store %arg6[%c0_32, %c0_33, %c0_34, %c0_35], %49 {strides = array<i32>} : memref<1x1x1x256xf32, #tpu.memory_space<vmem>>, vector<1x1x1x256xf32>,
    } else {
    }
    %c0 = arith.constant 0 : index
    %c0_1 = arith.constant 0 : index
    %c0_2 = arith.constant 0 : index
    %3 = vector.load %arg3[%c0, %c0_1, %c0_2] : memref<1x4x256xf32, #tpu.memory_space<vmem>>, vector<1x4x256xf32>
    %4 = vector.shape_cast %3 : vector<1x4x256xf32> to vector<4x256xf32>
    %c0_3 = arith.constant 0 : index
    %c0_4 = arith.constant 0 : index
    %c0_5 = arith.constant 0 : index
    %5 = vector.load %arg4[%c0_3, %c0_4, %c0_5] : memref<1x1x256xi32, #tpu.memory_space<vmem>>, vector<1x1x256xi32>
    %6 = vector.shape_cast %5 : vector<1x1x256xi32> to vector<1x256xi32>
    %c255_i32 = arith.constant 255 : i32
    %7 = vector.broadcast %c255_i32 : i32 to vector<1x256xi32>
    %8 = arith.cmpi ne, %6, %7 : vector<1x256xi32>
    %cst = arith.constant dense<0xFF800000> : vector<256xf32>
    %9 = vector.multi_reduction <maximumf>, %4, %cst [0] : vector<4x256xf32> to vector<256xf32>
    %10 = vector.shape_cast %9 : vector<256xf32> to vector<1x256xf32>
    %11 = vector.broadcast %10 : vector<1x256xf32> to vector<4x256xf32>
    %12 = arith.subf %4, %11 : vector<4x256xf32>
    %13 = math.exp %12 : vector<4x256xf32>
    %cst_6 = arith.constant dense<0.000000e+00> : vector<256xf32>
    %14 = vector.multi_reduction <add>, %13, %cst_6 [0] : vector<4x256xf32> to vector<256xf32>
    %15 = vector.shape_cast %14 : vector<256xf32> to vector<1x256xf32>
    %16 = math.log %15 : vector<1x256xf32>
    %17 = arith.addf %16, %10 : vector<1x256xf32>
    %18 = tpu.iota {dimensions = array<i32: 0>} : vector<4x256xi32>
    %19 = vector.broadcast %6 : vector<1x256xi32> to vector<4x256xi32>
    %20 = arith.cmpi eq, %18, %19 : vector<4x256xi32>
    %cst_7 = arith.constant 0.000000e+00 : f32
    %21 = vector.broadcast %cst_7 : f32 to vector<4x256xf32>
    %22 = arith.select %20, %4, %21 : vector<4x256xi1>, vector<4x256xf32>
    %cst_8 = arith.constant dense<0.000000e+00> : vector<256xf32>
    %23 = vector.multi_reduction <add>, %22, %cst_8 [0] : vector<4x256xf32> to vector<256xf32>
    %24 = vector.shape_cast %23 : vector<256xf32> to vector<1x256xf32>
    %c0_9 = arith.constant 0 : index
    %c0_10 = arith.constant 0 : index
    %c0_11 = arith.constant 0 : index
    %c0_12 = arith.constant 0 : index
    %25 = vector.load %arg5[%c0_9, %c0_10, %c0_11, %c0_12] : memref<1x1x1x256xf32, #tpu.memory_space<vmem>>, vector<1x1x1x256xf32>
    %26 = vector.shape_cast %25 : vector<1x1x1x256xf32> to vector<1x256xf32>
    %27 = arith.subf %17, %24 : vector<1x256xf32>
    %cst_13 = arith.constant 0.000000e+00 : f32
    %28 = vector.broadcast %cst_13 : f32 to vector<1x256xf32>
    %29 = arith.select %8, %27, %28 : vector<1x256xi1>, vector<1x256xf32>
    %30 = arith.addf %26, %29 : vector<1x256xf32>
    %c0_14 = arith.constant 0 : index
    %c0_15 = arith.constant 0 : index
    %c0_16 = arith.constant 0 : index
    %c0_17 = arith.constant 0 : index
    %31 = vector.load %arg5[%c0_14, %c0_15, %c0_16, %c0_17] : memref<1x1x1x256xf32, #tpu.memory_space<vmem>>, vector<1x1x1x256xf32>
    %32 = vector.shape_cast %31 : vector<1x1x1x256xf32> to vector<1x256xf32>
    %33 = vector.shape_cast %30 : vector<1x256xf32> to vector<1x1x1x256xf32>
    tpu.vector_store %arg5[%c0_14, %c0_15, %c0_16, %c0_17], %33 {strides = array<i32>} : memref<1x1x1x256xf32, #tpu.memory_space<vmem>>, vector<1x1x1x256xf32>,
    %c0_18 = arith.constant 0 : index
    %c0_19 = arith.constant 0 : index
    %c0_20 = arith.constant 0 : index
    %c0_21 = arith.constant 0 : index
    %34 = vector.load %arg6[%c0_18, %c0_19, %c0_20, %c0_21] : memref<1x1x1x256xf32, #tpu.memory_space<vmem>>, vector<1x1x1x256xf32>
    %35 = vector.shape_cast %34 : vector<1x1x1x256xf32> to vector<1x256xf32>
    %36 = arith.extui %8 : vector<1x256xi1> to vector<1x256xi32>
    %37 = arith.sitofp %36 : vector<1x256xi32> to vector<1x256xf32>
    %38 = arith.addf %35, %37 : vector<1x256xf32>
    %c0_22 = arith.constant 0 : index
    %c0_23 = arith.constant 0 : index
    %c0_24 = arith.constant 0 : index
    %c0_25 = arith.constant 0 : index
    %39 = vector.load %arg6[%c0_22, %c0_23, %c0_24, %c0_25] : memref<1x1x1x256xf32, #tpu.memory_space<vmem>>, vector<1x1x1x256xf32>
    %40 = vector.shape_cast %39 : vector<1x1x1x256xf32> to vector<1x256xf32>
    %41 = vector.shape_cast %38 : vector<1x256xf32> to vector<1x1x1x256xf32>
    tpu.vector_store %arg6[%c0_22, %c0_23, %c0_24, %c0_25], %41 {strides = array<i32>} : memref<1x1x1x256xf32, #tpu.memory_space<vmem>>, vector<1x1x1x256xf32>,
    return
  }
  func.func @transform_0(%arg0: i32, %arg1: i32, %arg2: i32) -> (i32, i32, i32) {
    %c1_i32 = arith.constant 1 : i32
    %0 = arith.muli %arg1, %c1_i32 : i32
    %1 = arith.addi %0, %arg2 : i32
    %c0_i32 = arith.constant 0 : i32
    %c0_i32_0 = arith.constant 0 : i32
    return %arg0, %c0_i32, %1 : i32, i32, i32
  }
  func.func @transform_1(%arg0: i32, %arg1: i32, %arg2: i32) -> (i32, i32, i32) {
    %c1_i32 = arith.constant 1 : i32
    %0 = arith.muli %arg1, %c1_i32 : i32
    %1 = arith.addi %0, %arg2 : i32
    %c0_i32 = arith.constant 0 : i32
    %c0_i32_0 = arith.constant 0 : i32
    return %arg0, %c0_i32, %1 : i32, i32, i32
  }
  func.func @transform_2(%arg0: i32, %arg1: i32, %arg2: i32) -> (i32, i32, i32, i32) {
    %c0_i32 = arith.constant 0 : i32
    %c0_i32_0 = arith.constant 0 : i32
    %c0_i32_1 = arith.constant 0 : i32
    return %arg0, %arg1, %c0_i32, %c0_i32_0 : i32, i32, i32, i32
  }
  func.func @transform_3(%arg0: i32, %arg1: i32, %arg2: i32) -> (i32, i32, i32, i32) {
    %c0_i32 = arith.constant 0 : i32
    %c0_i32_0 = arith.constant 0 : i32
    %c0_i32_1 = arith.constant 0 : i32
    return %arg0, %arg1, %c0_i32, %c0_i32_0 : i32, i32, i32, i32
  }
}

</mosaic_0001>

<bundles_post_ra>
// kernel: tpu_custom_call.1
= control target key start
LH: loop header
LB: loop body
LE: loop exit
PB: predicated region body
PF: predicated region fallthrough
CT: control target
= control target key end

     0   :  { %9 = vsyncpa [#allocation3], 0  ;;  %s1194_s0 = inlined_call_operand.hbm [shape: f32[2,4,256], index: 0, kind: input, shape index: {}]   ;;  %s1195_s1 = inlined_call_operand.hbm [shape: s32[2,1,256], index: 1, kind: input, shape index: {}]   ;;  %s1196_s2 = inlined_call_operand.hbm [shape: f32[2,1,1,256], index: 2, kind: output, shape index: {0}]   ;;  %s1197_s3 = inlined_call_operand.hbm [shape: f32[2,1,1,256], index: 3, kind: output, shape index: {1}]  }
   0x1   :  { %11 = vsyncpa [#allocation3 + $0x1], 0 }
   0x2   :  { %12 = vsyncpa [#allocation6], 0 }
   0x3   :  { %14 = vsyncpa [#allocation6 + $0x1], 0 }
   0x4   :  { %15 = vsyncpa [#allocation4], 0 }
   0x5   :  { %17 = vsyncpa [#allocation4 + $0x1], 0 }
   0x6   :  { %18 = vsyncpa [#allocation9], 0 }
   0x7   :  { %20 = vsyncpa [#allocation9 + $0x1], 0  ;;  %s902_s12 = smov 0   ;;  %s904_s13 = smov 0  }
   0x8   :  { %s906_s14 = smov 0   ;;  %s908_s15 = smov 0  }
   0x9   :  { %s910_s16 = smov 0   ;;  %s912_s17 = smov 0  }
   0xa LB: > { %s587_s18 = sadd.s32 4294967295, %s874_s17   ;;  %s588_s19 = sadd.s32 4294967294, %s874_s17   ;;  %s874_s17 = sphi %s912_s17, %s26_s17   ;;  %s870_s16 = sphi %s910_s16, %s1219_s16   ;;  %s866_s15 = sphi %s908_s15, %s1218_s15   ;;  %s862_s14 = sphi %s906_s14, %s1217_s14   ;;  %s858_s13 = sphi %s904_s13, %s1216_s13   ;;  %s854_s12 = sphi %s902_s12, %s1215_s12  }
   0xb   : > { %s45_s20 = sadd.s32 1, %s870_s16  ;;  %s56_s21 = sadd.s32 1, %s862_s14 }
   0xc   : > { %p47_p0 = scmp.ge.s32.totalorder %s45_s20, 2  ;;  %p63_p1 = scmp.ne.s32.totalorder %s862_s14, %s858_s13 }
   0xd   : > { %p64_p2 = scmp.eq.s32.totalorder %s874_s17, 0  ;;  %p69_p3 = scmp.ne.s32.totalorder %s858_s13, %s854_s12 }
   0xe   : > { %s1221_s20 = smov (%p47_p0, %s45_s20), 0  ;;  %p70_p5 = scmp.eq.s32.totalorder %s587_s18, 0 }
   0xf   : > { %p943_p4 = por %p64_p2, %p63_p1  ;;  %s51_s23 = ssub.s32 %s870_s16, %s1221_s20 }
  0x10   : > { %p125_p6 = scmp.eq.s32.totalorder %s587_s18, 1  ;;  %p54_p7 = scmp.eq.s32.totalorder %s51_s23, 0 }
  0x11   : > { %p949_p8 = por %p70_p5, %p69_p3  ;;  %p131_p10 = scmp.eq.s32.totalorder %s588_s19, 1 }
  0x12   : > { %p953_p9 = por %p125_p6, %p63_p1  ;;  %p637_p13 = scmp.lt.s32.totalorder %s874_s17, 2 }
  0x13   : > { %s1201_s24 = scalar_select %p949_p8, 1, 0 }
  0x14   : > { %s1202_s25 = scalar_select %p953_p9, 1, 0 }
  0x15   : > { %s958_s26 = scalar_select %p54_p7, %s862_s14, %s56_s21  }
  0x16   : > { %p960_p11 = por %p131_p10, %p69_p3  ;;  %s967_s28 = sand.u32 1, %s862_s14  }
  0x17   : > { %s591_s29 = sshll.u32 %s967_s28, 3  ;;  %s611_s30 = sshll.u32 %s870_s16, 7 }
  0x18   : > { %s1203_s27 = scalar_select %p960_p11, 1, 0 }
  0x19   : > { %s974_s6 = scalar_lea.hbm %s1194_s0, %s611_s30  ;;  %s183_s7 = scalar_lea.vmem [#allocation2], %s591_s29 }
  0x1a   : > { %s194_s8 = sshll.u32 %s183_s7, 4  ;;  %p980_p0 = pnand %p637_p13, %p943_p4  ;;  %s976_s8 = int_to_ptr.vmem [resolvable:$true] %s194_s8 }
  0x1b   : > { %s180_s10 = scalar_lea.sflag [#allocation3], %s967_s28  ;;  %s696_s11 = scalar_lea.hbm %s974_s6, 128 }
  0x1c   : > { %p697_p3 = scmp.ne.s32.totalorder %s974_s6, %s696_s11  ;;  %p698_p5 = pneg %p980_p0 }
  0x1d   : > { %s701_s21 = scalar_lea.hbm %s1194_s0, 256  ;;  %p702_p4 = scmp.lt.u32.totalorder %s974_s6, %s1194_s0 }
  0x1e   : > { %p699_p6 = pnand %p698_p5, %p697_p3  ;;  %p703_p10 = scmp.lt.u32.totalorder %s701_s21, %s696_s11 }
  0x1f   : > { %p705_p12 = scmp.lt.u32.totalorder %s696_s11, %s974_s6 }
  0x20   : > { %p700_p7 = pneg %p699_p6  ;;  %p704_p13 = por %p703_p10, %p702_p4 }
  0x22   : > { %p706_p1 = por %p705_p12, %p704_p13 }
  0x24   : > { %p707_p2 = pnand %p706_p1, %p700_p7 }
  0x26   : > { %710 = shalt.err (!%p707_p2)
}
  0x27   : > { %s711_s29 = scalar_lea.vmem %s976_s8, 128  ;;  %s876_s30 = smov [#allocation2]  }
  0x28   : > { %p712_p3 = scmp.ne.s32.totalorder %s976_s8, %s711_s29  ;;  %s716_s4 = sshll.u32 %s876_s30, 4  ;;  %s717_s4 = int_to_ptr.vmem [resolvable:$false] %s716_s4 }
  0x29   : > { %s718_s5 = scalar_lea.vmem %s717_s4, 256  ;;  %p719_p9 = scmp.lt.s32.totalorder %s976_s8, %s717_s4 }
  0x2a   : > { %p714_p6 = pnand %p712_p3, %p698_p5  ;;  %p720_p4 = scmp.lt.s32.totalorder %s718_s5, %s711_s29 }
  0x2c   : > { %p715_p11 = pneg %p714_p6  ;;  %p721_p10 = por %p720_p4, %p719_p9 }
  0x2e   : > { %p722_p12 = pnand %p721_p10, %p715_p11 }
  0x30   : > { %725 = shalt.err (!%p722_p12)
}
  0x31   : > { %626 = dma.hbm_to_vmem [thread:$0]  (!%p980_p0), %s974_s6, 128, %s976_s8, %s180_s10  }
  0x32   : > { %p1205_p1 = scmp.lt.s32.totalorder %s874_s17, 3  ;;  %p1206_p2 = scmp.ge.s32.totalorder %s874_s17, 1 }
  0x33   : > { %s594_s11 = sshll.u32 %s967_s28, 1  ;;  %s612_s18 = sshll.u32 %s870_s16, 5 }
  0x34   : > { %p1016_p7 = pnand %p1206_p2, %p1205_p1  ;;  %s1025_s22 = scalar_lea.hbm %s1195_s1, %s612_s18 }
  0x35   : > { %s205_s23 = scalar_lea.vmem [#allocation5], %s594_s11  ;;  %s202_s6 = scalar_lea.sflag [#allocation6], %s967_s28 }
  0x36   : > { %s1207_s7 = scalar_select %p1016_p7, 1, 0 }
  0x37   : > { %s216_s29 = sshll.u32 %s205_s23, 4  ;;  %s726_s8 = scalar_lea.hbm %s1025_s22, 32  ;;  %s217_s29 = int_to_ptr.vmem [resolvable:$true] %s216_s29 }
  0x38   : > { %p727_p9 = scmp.ne.s32.totalorder %s1025_s22, %s726_s8  ;;  %s731_s4 = scalar_lea.hbm %s1195_s1, 64 }
  0x39   : > { %p732_p3 = scmp.lt.u32.totalorder %s1025_s22, %s1195_s1  ;;  %p733_p6 = scmp.lt.u32.totalorder %s731_s4, %s726_s8 }
  0x3a   : > { %p729_p11 = pnand %p727_p9, %p698_p5  ;;  %p735_p10 = scmp.lt.u32.totalorder %s726_s8, %s1025_s22 }
  0x3b   : > { %p734_p4 = por %p733_p6, %p732_p3 }
  0x3c   : > { %p730_p13 = pneg %p729_p11 }
  0x3d   : > { %p736_p12 = por %p735_p10, %p734_p4 }
  0x3f   : > { %p737_p1 = pnand %p736_p12, %p730_p13 }
  0x41   : > { %740 = shalt.err (!%p737_p1)
}
  0x42   : > { %s741_s28 = scalar_lea.vmem %s217_s29, 32  ;;  %s877_s11 = smov [#allocation5]  }
  0x43   : > { %p742_p2 = scmp.ne.s32.totalorder %s217_s29, %s741_s28  ;;  %s746_s19 = sshll.u32 %s877_s11, 4  ;;  %s747_s19 = int_to_ptr.vmem [resolvable:$false] %s746_s19 }
  0x44   : > { %s748_s21 = scalar_lea.vmem %s747_s19, 64  ;;  %p749_p8 = scmp.lt.s32.totalorder %s217_s29, %s747_s19 }
  0x45   : > { %p744_p9 = pnand %p742_p2, %p698_p5  ;;  %p750_p7 = scmp.lt.s32.totalorder %s748_s21, %s741_s28 }
  0x47   : > { %p745_p11 = pneg %p744_p9  ;;  %p751_p3 = por %p750_p7, %p749_p8 }
  0x49   : > { %p752_p6 = pnand %p751_p3, %p745_p11 }
  0x4b   : > { %755 = shalt.err (!%p752_p6)
}
  0x4c   : > { %629 = dma.hbm_to_vmem [thread:$0]  (!%p980_p0), %s1025_s22, 32, %s217_s29, %s202_s6  }
  0x4d   : > { %p1208_p13 = scmp.ne.s32.totalorder %s1207_s7, 0 }
  0x4e   : > { %s1050_s23 = sand.u32 (!%p1208_p13), 1, %s858_s13   ;;  %p1209_p5 = scmp.ne.s32.totalorder (!%p1208_p13), %s1201_s24, 0 }
  0x4f   : > { %225 = sbr.rel (%p1208_p13) target bundleno = 194 (0xc2), region = 28  ;;  %s598_s8 = sshll.u32 (!%p1208_p13), %s1050_s23, 3 }
  0x50   : > { %s228_s10 = scalar_lea.sflag (!%p1208_p13), [#allocation3], %s1050_s23  ;;  %s231_s30 = scalar_lea.vmem (!%p1208_p13), [#allocation2], %s598_s8 }
  0x56   : > { %837 = dma.done.wait (%p1209_p5), %s228_s10, 128  }
  0x57   : > { %839 = vsyncadd (%p1209_p5), %s228_s10, 4294967168  ;;  %s599_s9 = sshll.u32 %s1050_s23, 1  ;;  %s237_s7 = scalar_lea.sflag [#allocation6], %s1050_s23 }
  0x58   : > { %s240_s22 = scalar_lea.vmem [#allocation5], %s599_s9 }
  0x59   : > { %841 = dma.done.wait (%p1209_p5), %s237_s7, 32  }
  0x5a   : > { %843 = vsyncadd (%p1209_p5), %s237_s7, 4294967264  ;;  %v281_v0 = vlaneseq  ;;  %s1068_s29 = scalar_lea.vmem [#allocation7], %s599_s9  ;;  %v878_v2 = vmov 0.0   ;;  %s272_s6 = scalar_lea.vmem [#allocation8], %s599_s9  ;;  %vm293_vm1 = vcmask 1043456   ;;  %v1075_v3 = vld [vmem:[%s231_s30] sm:$0xff] }
  0x5b   : > { %v1077_v4 = vld [vmem:[%s240_s22] sm:$0x3]  ;;  %v1082_v5 = vcombine.high %v1075_v3, %v1075_v3  ;;  %v294_v6 = vsel %vm293_vm1, %v1075_v3, -inf  ;;  %s613_s24 = sshll.u32 %s866_s15, 5  ;;  %s437_s4 = sshll.u32 %s272_s6, 4  ;;  %s1098_s4 = int_to_ptr.vmem [resolvable:$true] %s437_s4 }
  0x5c   : > { %vm1064_vm0 = vcmp.lt.s32.totalorder %v281_v0, 256  ;;  %vm289_vm2 = vcmp.ne.s32.totalorder %v1077_v4, 255  ;;  %v295_v7 = vrot.slane %v294_v6, 4  ;;  %s1096_s28 = scalar_lea.hbm %s1197_s3, %s613_s24  ;;  %s405_s11 = scalar_lea.sflag [#allocation9], %s1050_s23 }
  0x5d   : > { %285 = vst.msk [vmem:[%s1068_s29] sm:$0x3] %vm1064_vm0, %v878_v2  ;;  %286 = vst.msk [vmem:[%s272_s6] sm:$0x3] %vm1064_vm0, %v878_v2  ;;  %v602_v8 = vsel %vm289_vm2, 1.0, %v878_v2  ;;  %v301_v9 = vsel %vm293_vm1, %v1082_v5, -inf }
  0x5e   : > { %v296_v11 = vmax.f32 %v294_v6, %v295_v7  ;;  %v302_v12 = vrot.slane %v301_v9, 4  ;;  %s756_s19 = scalar_lea.vmem %s1098_s4, 32  ;;  %p1212_p0 = scmp.ne.s32.totalorder %s1202_s25, 0 }
  0x5f   : > { %p757_p8 = scmp.ne.s32.totalorder %s1098_s4, %s756_s19  ;;  %s879_s21 = smov [#allocation8]  }
  0x60   : > { %v297_v14 = vrot.slane %v296_v11, 2  ;;  %v303_v15 = vmax.f32 %v301_v9, %v302_v12  ;;  %s760_s8 = sshll.u32 %s879_s21, 4  ;;  %s761_s8 = int_to_ptr.vmem [resolvable:$false] %s760_s8 }
  0x61   : > { %p758_p7 = pnand %p757_p8, %p1212_p0  ;;  %s762_s10 = scalar_lea.vmem %s761_s8, 64 }
  0x62   : > { %v298_v16 = vmax.f32 %v296_v11, %v297_v14  ;;  %v304_v17 = vrot.slane %v303_v15, 2  ;;  %p763_p10 = scmp.lt.s32.totalorder %s1098_s4, %s761_s8  ;;  %p764_p12 = scmp.lt.s32.totalorder %s762_s10, %s756_s19 }
  0x63   : > { %p759_p4 = pneg %p758_p7 }
  0x64   : > { %v394_v10 = vld [vmem:[%s272_s6] sm:$0x3]  ;;  %p765_p1 = por %p764_p12, %p763_p10 }
  0x65   : > { %v397_v13 = vadd.f32 %v602_v8, %v394_v10 }
  0x66   : > { %p766_p2 = pnand %p765_p1, %p759_p4 }
  0x67   : > { %398 = vst.msk [vmem:[%s272_s6] sm:$0x3] %vm1064_vm0, %v397_v13 }
  0x68   : > { %769 = shalt.err (!%p766_p2)
}
  0x69   : > { %s770_s30 = scalar_lea.hbm %s1096_s28, 32  ;;  %s774_s22 = scalar_lea.hbm %s1197_s3, 64 }
  0x6a   : > { %p771_p9 = scmp.ne.s32.totalorder %s1096_s28, %s770_s30  ;;  %p775_p6 = scmp.lt.u32.totalorder %s1096_s28, %s1197_s3 }
  0x6b   : > { %p776_p13 = scmp.lt.u32.totalorder %s774_s22, %s770_s30  ;;  %p778_p8 = scmp.lt.u32.totalorder %s770_s30, %s1096_s28 }
  0x6c   : > { %p772_p11 = pnand %p771_p9, %p1212_p0 }
  0x6d   : > { %p777_p5 = por %p776_p13, %p775_p6 }
  0x6e   : > { %p773_p3 = pneg %p772_p11 }
  0x6f   : > { %p779_p7 = por %p778_p8, %p777_p5 }
  0x71   : > { %p780_p4 = pnand %p779_p7, %p773_p3 }
  0x73   : > { %783 = shalt.err (!%p780_p4)
}
  0x74   : > { %620 = dma.vmem_to_hbm [thread:$0]  (%p1212_p0), %s1098_s4, 32, %s1096_s28, %s405_s11   ;;  %v299_v18 = vrot.slane %v298_v16, 1  ;;  %v305_v19 = vmax.f32 %v303_v15, %v304_v17  ;;  %v339_v24 = vshrl.u32 %v281_v0, 7  ;;  %v880_v61 = vmov 1966171168  }
  0x75   : > { %v373_v62 = vunpack.c.l.s4 %v880_v61  ;;  %v366_v15 = vld [vmem:[%s1068_s29] sm:$0x3]  ;;  %s421_s4 = sshll.u32 %s1068_s29, 4  ;;  %s1142_s11 = scalar_lea.hbm %s1196_s2, %s613_s24  ;;  %s1144_s4 = int_to_ptr.vmem [resolvable:$true] %s421_s4 }
  0x76   : > { %v300_v20 = vmax.f32 %v298_v16, %v299_v18  ;;  %v306_v21 = vrot.slane %v305_v19, 1  ;;  %v342_v27 = vsub.s32 0, %v339_v24  ;;  %v346_v28 = vsub.s32 1, %v339_v24  ;;  %s400_s19 = scalar_lea.sflag [#allocation4], %s1050_s23  ;;  %s784_s21 = scalar_lea.vmem %s1144_s4, 32 }
  0x77   : > { %v374_v8 = vunpack.c.0.s8 %v373_v62  ;;  %p785_p10 = scmp.ne.s32.totalorder %s1144_s4, %s784_s21  ;;  %s881_s15 = smov [#allocation7]  }
  0x78   : > { %v307_v22 = vmax.f32 %v305_v19, %v306_v21  ;;  %v343_v29 = vrot.slane %v1077_v4, %v342_v27  ;;  %v347_v30 = vrot.slane %v1077_v4, %v346_v28  ;;  %s788_s8 = sshll.u32 %s881_s15, 4  ;;  %s789_s8 = int_to_ptr.vmem [resolvable:$false] %s788_s8 }
  0x79   : > { %v377_v12 = vsub.s32 %v374_v8, %v339_v24  ;;  %p786_p12 = pnand %p785_p10, %p1212_p0  ;;  %s790_s10 = scalar_lea.vmem %s789_s8, 64 }
  0x7a   : > { %v310_v23 = vcombine.low %v300_v20, %v307_v22  ;;  %vm348_vm3 = vcmp.eq.s32.totalorder %v339_v24, %v343_v29  ;;  %vm349_vm4 = vcmp.eq.s32.totalorder %v339_v24, %v347_v30  ;;  %p791_p2 = scmp.lt.s32.totalorder %s1144_s4, %s789_s8  ;;  %p792_p9 = scmp.lt.s32.totalorder %s790_s10, %s784_s21 }
  0x7b   : > { %v350_v31 = vsel %vm348_vm3, %v1075_v3, 0.0  ;;  %v351_v35 = vsel %vm349_vm4, %v1082_v5, 0.0  ;;  %p787_p1 = pneg %p786_p12 }
  0x7c   : > { %v312_v25 = vsub.f32 %v1075_v3, %v310_v23  ;;  %v352_v37 = vsel %vm293_vm1, %v350_v31, 0.0  ;;  %v359_v41 = vsel %vm293_vm1, %v351_v35, 0.0  ;;  %p793_p11 = por %p792_p9, %p791_p2 }
  0x7d   : > { %v353_v42 = vrot.slane %v352_v37, 4  ;;  %v360_v45 = vrot.slane %v359_v41, 4 }
  0x7e   : > { %v313_v26 = vmul.f32 1.442695, %v312_v25  ;;  %p794_p3 = pnand %p793_p11, %p787_p1 }
  0x7f   : > { %v354_v48 = vadd.f32 %v353_v42, %v352_v37  ;;  %v361_v51 = vadd.f32 %v360_v45, %v359_v41 }
  0x80   : > { %690 = vpow2.f32 %v313_v26 }
  0x81   : > { %v355_v54 = vrot.slane %v354_v48, 2  ;;  %v362_v56 = vrot.slane %v361_v51, 2 }
  0x83   : > { %v356_v57 = vadd.f32 %v355_v54, %v354_v48  ;;  %v363_v58 = vadd.f32 %v362_v56, %v361_v51 }
  0x85   : > { %v357_v59 = vrot.slane %v356_v57, 1  ;;  %v364_v60 = vrot.slane %v363_v58, 1 }
  0x87   : > { %v358_v2 = vadd.f32 %v357_v59, %v356_v57  ;;  %v365_v7 = vadd.f32 %v364_v60, %v363_v58 }
  0x8a   : > { %v691_v32 = vpop.eup %690 }
  0x8b   : > { %v316_v33 = vcombine.high %v691_v32, %v691_v32  ;;  %v318_v34 = vsel %vm293_vm1, %v691_v32, 0.0 }
  0x8c   : > { %v319_v36 = vrot.slane %v318_v34, 4 }
  0x8d   : > { %v325_v38 = vsel %vm293_vm1, %v316_v33, 0.0 }
  0x8e   : > { %v320_v39 = vadd.f32 %v319_v36, %v318_v34  ;;  %v326_v40 = vrot.slane %v325_v38, 4 }
  0x90   : > { %v321_v43 = vrot.slane %v320_v39, 2  ;;  %v327_v44 = vadd.f32 %v326_v40, %v325_v38 }
  0x92   : > { %v322_v46 = vadd.f32 %v321_v43, %v320_v39  ;;  %v328_v47 = vrot.slane %v327_v44, 2 }
  0x94   : > { %v323_v49 = vrot.slane %v322_v46, 1  ;;  %v329_v50 = vadd.f32 %v328_v47, %v327_v44 }
  0x96   : > { %v324_v52 = vadd.f32 %v323_v49, %v322_v46  ;;  %v330_v53 = vrot.slane %v329_v50, 1 }
  0x98   : > { %v331_v55 = vadd.f32 %v330_v53, %v329_v50  ;;  %692 = vlog2.f32 %v324_v52 }
  0x9a   : > { %694 = vlog2.f32 %v331_v55 }
  0xa2   : > { %v693_v63 = vpop.eup %692 }
  0xa3   : > { %v333_v0 = vmul.f32 0.6931472, %v693_v63 }
  0xa4   : > { %v695_v3 = vpop.eup %694 }
  0xa5   : > { %v335_v5 = vmul.f32 0.6931472, %v695_v3  ;;  %v336_v6 = vadd.f32 %v333_v0, %v300_v20 }
  0xa7   : > { %v337_v9 = vadd.f32 %v335_v5, %v307_v22  ;;  %v367_v10 = vsub.f32 %v336_v6, %v358_v2 }
  0xa9   : > { %v368_v11 = vsub.f32 %v337_v9, %v365_v7 }
  0xab   : > { %v371_v13 = vcombine.low %v367_v10, %v368_v11 }
  0xad   : > { %v378_v14 = vrot.slane %v371_v13, %v377_v12 }
  0xaf   : > { %v385_v16 = vrot.slane %v378_v14, %v377_v12 }
  0xb1   : > { %v387_v17 = vsel %vm289_vm2, %v385_v16, 0.0 }
  0xb2   : > { %v388_v18 = vadd.f32 %v387_v17, %v366_v15 }
  0xb4   : > { %393 = vst.msk [vmem:[%s1068_s29] sm:$0x3] %vm1064_vm0, %v388_v18 }
  0xb5   : > { %797 = shalt.err (!%p794_p3)
}
  0xb6   : > { %s798_s23 = scalar_lea.hbm %s1142_s11, 32  ;;  %s802_s30 = scalar_lea.hbm %s1196_s2, 64 }
  0xb7   : > { %p799_p6 = scmp.ne.s32.totalorder %s1142_s11, %s798_s23  ;;  %p803_p8 = scmp.lt.u32.totalorder %s1142_s11, %s1196_s2 }
  0xb8   : > { %p804_p7 = scmp.lt.u32.totalorder %s802_s30, %s798_s23  ;;  %p806_p10 = scmp.lt.u32.totalorder %s798_s23, %s1142_s11 }
  0xb9   : > { %p800_p13 = pnand %p799_p6, %p1212_p0 }
  0xba   : > { %p805_p4 = por %p804_p7, %p803_p8 }
  0xbb   : > { %p801_p5 = pneg %p800_p13 }
  0xbc   : > { %p807_p12 = por %p806_p10, %p805_p4 }
  0xbe   : > { %p808_p1 = pnand %p807_p12, %p801_p5 }
  0xc0   : > { %811 = shalt.err (!%p808_p1)
}
  0xc1   : > { %619 = dma.vmem_to_hbm [thread:$0]  (%p1212_p0), %s1144_s4, 32, %s1142_s11, %s400_s19  }
  0xc2 PF: > { %s449_s22 = sand.u32 1, %s854_s12   ;;  %p1213_p2 = scmp.ne.s32.totalorder %s1203_s27, 0 }
  0xc3   : > { %p1214_p9 = scmp.ge.s32.totalorder %s874_s17, 2  ;;  %s450_s6 = scalar_lea.sflag [#allocation4], %s449_s22 }
  0xc5   : > { %p631_p11 = pnand %p1214_p9, %p1213_p2 }
  0xc7   : > { %845 = dma.done.wait (!%p631_p11), %s450_s6, 32  }
  0xc8   : > { %847 = vsyncadd (!%p631_p11), %s450_s6, 4294967264  ;;  %s459_s5 = scalar_lea.sflag [#allocation9], %s449_s22 }
  0xc9   : > { %849 = dma.done.wait (!%p631_p11), %s459_s5, 32  }
  0xca   : > { %851 = vsyncadd (!%p631_p11), %s459_s5, 4294967264  ;;  %s26_s17 = sadd.s32 1, %s874_s17   ;;  %s1215_s12 = smov %s858_s13 }
  0xcb   : > { %p23_p3 = scmp.ge.s32.totalorder %s26_s17, 4   ;;  %s1216_s13 = smov %s862_s14 }
  0xcc   : > { %s1217_s14 = smov %s958_s26  ;;  %s1218_s15 = smov %s870_s16 }
  0xcd   : > { %s1219_s16 = smov %s1221_s20  ;;  %25 = sbr.rel (!%p23_p3) target bundleno = 10 (0xa), region = 107 }
  0xd4   :  { %464 = vsyncpa [#allocation3], 1 }
  0xd5   :  { %466 = vsyncpa [#allocation3 + $0x1], 1 }
  0xd6   :  { %467 = vsyncpa [#allocation6], 1 }
  0xd7   :  { %469 = vsyncpa [#allocation6 + $0x1], 1 }
  0xd8   :  { %470 = vsyncpa [#allocation4], 1 }
  0xd9   :  { %472 = vsyncpa [#allocation4 + $0x1], 1 }
  0xda   :  { %473 = vsyncpa [#allocation9], 1 }
  0xdb   :  { %475 = vsyncpa [#allocation9 + $0x1], 1 }

</bundles_post_ra>
